<compile_context>
chip_gen: v7x
topology: tpu7x:2x2x1
jax: 0.10.0
libtpu: 0.0.40
codegen_flags: <defaults>
</compile_context>

<pallas_src>
import functools

import jax
import jax.numpy as jnp
from jax import lax
from jax.experimental import pallas as pl
from jax.experimental.pallas import tpu as pltpu

_LANE = 128
_SUBLANE = 8
_BATCH_TILE = 256   # target M-fill for v6e/v7x MXU; clamped for tiny batches


def _round_up(n, m):
    return ((n + m - 1) // m) * m


def _make_kernel(n_layers: int, out_dim: int, batch: int, tile_m: int,
                 has_pad_rows: bool):
    """Kernel over padded tensors.

    x_ref:   [tile_m, P]   padded activation tile (zeros outside real rows/cols)
    w_ref:   [L, P, P]     per-layer padded weights (last layer = fused head)
    b_ref:   [Lp, P]       per-layer padded biases
    out_ref: [tile_m, P]   q_partial = adv + val (mean subtracted in wrapper)
    sum_ref: [1, 8, 128]   per-tile advantage sum (broadcast-filled)
    """
    sum_col = out_dim + 1   # fused head layout: [adv (out_dim) | val | adv-sum]

    def kernel(x_ref, w_ref, b_ref, out_ref, sum_ref):
        h = x_ref[...]

        # trunk: full 128-wide MXU tiles + bias + ReLU.  Zero-padded W
        # rows/cols and zero-padded bias keep padded activation lanes exactly
        # zero for real batch rows.
        for l in range(n_layers - 1):
            h = jnp.dot(h, w_ref[l], preferred_element_type=jnp.float32)
            h = jnp.maximum(h + b_ref[pl.ds(l, 1), :], 0.0)

        # fused head, single MXU pass: columns [0,out_dim) = advantages,
        # column out_dim = value, column out_dim+1 = per-row advantage sum.
        head = (jnp.dot(h, w_ref[n_layers - 1],
                        preferred_element_type=jnp.float32)
                + b_ref[pl.ds(n_layers - 1, 1), :])

        # per-row advantage sums already computed on the MXU; restrict to real
        # batch rows (padded zero-input rows pick up relu(bias) garbage), then
        # a single-column sublane reduce.
        col = head[:, sum_col:sum_col + 1]                       # [tile_m, 1]
        if has_pad_rows:
            row = (pl.program_id(0) * tile_m
                   + lax.broadcasted_iota(jnp.int32, (tile_m, 1), 0))
            col = jnp.where(row < batch, col, 0.0)
        sum_ref[...] = jnp.broadcast_to(jnp.sum(col), sum_ref.shape)

        # partial dueling combine: q_partial = adv + val.  The global mean
        # couples every batch tile, so the scalar mean subtraction is deferred
        # to the jitted wrapper (fuses with the output slice); this keeps the
        # batch grid axis "parallel".  Lanes >= out_dim (2*val, sum+val, pads)
        # are junk and get sliced off outside; store stays unmasked/lane-dense.
        val = head[:, out_dim:out_dim + 1]
        out_ref[...] = head + val

    return kernel


def prepare_params(params):
    """One-time parameter packing (hoisted out of the per-call hot path).

    params: 'layers' = [(W [in,out], b [1,out]), ...] (input + hidden),
            'adv' = (W, b), 'val' = (W, b).
    Returns (w_packed [L,P,P], b_packed [Lp,P], meta) — reuse for every call.
    """
    layers = list(params["layers"])
    w_adv, b_adv = params["adv"]
    w_val, b_val = params["val"]
    out_dim = w_adv.shape[1]

    # fused head: [ adv (out_dim) | val (1) | adv row-sum (1) ]
    w_sum = jnp.sum(w_adv, axis=1, keepdims=True)        # == W_adv @ ones
    b_sum = jnp.sum(b_adv, axis=1, keepdims=True)
    w_head = jnp.concatenate([w_adv, w_val, w_sum], axis=1)
    b_head = jnp.concatenate([b_adv, b_val, b_sum], axis=1)

    all_w = [w for (w, _) in layers] + [w_head]
    all_b = [b for (_, b) in layers] + [b_head]
    L = len(all_w)
    in_dim = all_w[0].shape[0]

    P = _round_up(max([w.shape[0] for w in all_w]
                      + [w.shape[1] for w in all_w]), _LANE)
    Lp = _round_up(L, _SUBLANE)

    w_packed = jnp.zeros((L, P, P), jnp.float32)
    b_packed = jnp.zeros((Lp, P), jnp.float32)
    for i, (w, b) in enumerate(zip(all_w, all_b)):
        w_packed = w_packed.at[i, :w.shape[0], :w.shape[1]].set(
            w.astype(jnp.float32))
        b_packed = b_packed.at[i, :b.shape[1]].set(b[0].astype(jnp.float32))

    meta = dict(in_dim=in_dim, out_dim=out_dim, n_layers=L)
    return jax.device_put(w_packed), jax.device_put(b_packed), meta


@functools.partial(jax.jit, static_argnames=("in_dim", "out_dim", "n_layers"))
def duelling_dnn_forward(x, w_packed, b_packed, *, in_dim, out_dim, n_layers):
    B = x.shape[0]
    P = w_packed.shape[-1]
    L = n_layers

    # batch tiling: 256-row tiles fill the v6e/v7x MXU M dim for large
    # batches; a single small tile for tiny batches.  Grid axis is "parallel"
    # (v7x megacore); weight/bias slabs stay resident via constant index maps.
    Bp = _round_up(B, _SUBLANE)
    if Bp <= _BATCH_TILE:
        tile_m = Bp
    else:
        tile_m = _BATCH_TILE
        Bp = _round_up(B, _BATCH_TILE)
    n_tiles = Bp // tile_m

    x_pad = jnp.pad(x.astype(jnp.float32), ((0, Bp - B), (0, P - in_dim)))

    kernel = _make_kernel(L, out_dim, B, tile_m, has_pad_rows=(Bp != B))

    flops = 2 * Bp * P * P * L
    bytes_accessed = (x_pad.size + w_packed.size + b_packed.size
                      + Bp * P + n_tiles * _SUBLANE * _LANE) * 4

    out_pad, tile_sums = pl.pallas_call(
        kernel,
        out_shape=(jax.ShapeDtypeStruct((Bp, P), jnp.float32),
                   jax.ShapeDtypeStruct((n_tiles, _SUBLANE, _LANE),
                                        jnp.float32)),
        grid=(n_tiles,),
        in_specs=[
            pl.BlockSpec((tile_m, P), lambda i: (i, 0)),         # activations
            pl.BlockSpec(w_packed.shape, lambda i: (0, 0, 0)),   # resident W
            pl.BlockSpec(b_packed.shape, lambda i: (0, 0)),      # resident b
        ],
        out_specs=(
            pl.BlockSpec((tile_m, P), lambda i: (i, 0)),         # q_partial
            pl.BlockSpec((1, _SUBLANE, _LANE), lambda i: (i, 0, 0)),
        ),
        compiler_params=pltpu.CompilerParams(
            dimension_semantics=("parallel",)),
        cost_estimate=pl.CostEstimate(flops=flops, transcendentals=0,
                                      bytes_accessed=bytes_accessed),
    )(x_pad, w_packed, b_packed)

    # global dueling mean (couples all batch tiles): one scalar fix-up, fused
    # by XLA with the output slice under jit.  Matches torch advantages.mean().
    adv_mean = jnp.sum(tile_sums[:, 0, 0]) * (1.0 / float(B * out_dim))
    return out_pad[:B, :out_dim] - adv_mean


def init_params(key, in_dim, out_dim, h_dim):
    """Deterministic synthetic parameters (shapes match the PyTorch module)."""
    dims = [in_dim] + list(h_dim)
    layers = []
    for i in range(len(dims) - 1):
        key, kw, kb = jax.random.split(key, 3)
        w = jax.random.normal(kw, (dims[i], dims[i + 1]), jnp.float32) * 0.1
        b = jax.random.normal(kb, (1, dims[i + 1]), jnp.float32) * 0.1
        layers.append((w, b))
    key, kw, kb = jax.random.split(key, 3)
    w_adv = jax.random.normal(kw, (h_dim[-1], out_dim), jnp.float32) * 0.1
    b_adv = jax.random.normal(kb, (1, out_dim), jnp.float32) * 0.1
    key, kw, kb = jax.random.split(key, 3)
    w_val = jax.random.normal(kw, (h_dim[-1], 1), jnp.float32) * 0.1
    b_val = jax.random.normal(kb, (1, 1), jnp.float32) * 0.1
    return {"layers": layers, "adv": (w_adv, b_adv), "val": (w_val, b_val)}


def reference_forward(x, params):
    """Pure-JAX reference matching the PyTorch forward exactly."""
    h = x
    for (w, b) in params["layers"]:
        h = jnp.maximum(h @ w + b, 0.0)
    adv = h @ params["adv"][0] + params["adv"][1]
    val = h @ params["val"][0] + params["val"][1]
    return val + (adv - jnp.mean(adv))


if __name__ == "__main__":
    in_dim, out_dim = 16, 8
    h_dim = [32, 32]
    batch = 8

    key = jax.random.PRNGKey(0)
    key, kx = jax.random.split(key)
    x = jax.random.normal(kx, (batch, in_dim), jnp.float32)
    params = init_params(key, in_dim, out_dim, h_dim)

    # one-time packing (outside the hot path), then jitted forward
    w_packed, b_packed, meta = prepare_params(params)
    qvals = duelling_dnn_forward(x, w_packed, b_packed, **meta)
    qvals = jax.block_until_ready(qvals)

    ref = reference_forward(x, params)
    assert qvals.shape == (batch, out_dim)
    assert jnp.allclose(qvals, ref, atol=1e-4, rtol=1e-4), "mismatch vs reference"

    print("KERNEL_OK")
</pallas_src>

<mosaic_0001>
module attributes {stable_mosaic.version = 11 : i64} {
  func.func @kernel(%arg0: i32, %arg1: memref<8x128xf32, #tpu.memory_space<vmem>>, %arg2: memref<3x128x128xf32, #tpu.memory_space<vmem>>, %arg3: memref<8x128xf32, #tpu.memory_space<vmem>>, %arg4: memref<8x128xf32, #tpu.memory_space<vmem>>, %arg5: memref<1x8x128xf32, #tpu.memory_space<vmem>>) attributes {dimension_semantics = [#tpu.dimension_semantics<parallel>], iteration_bounds = array<i64: 1>, scalar_prefetch = 0 : i64, scratch_operands = 0 : i64, tpu.core_type = #tpu.core_type<tc>, window_params = [{transform_indices = @transform_0, window_bounds = array<i64: 8, 128>}, {pipeline_mode = #tpu.pipeline_mode<synchronous>, transform_indices = @transform_1, window_bounds = array<i64: 3, 128, 128>}, {pipeline_mode = #tpu.pipeline_mode<synchronous>, transform_indices = @transform_2, window_bounds = array<i64: 8, 128>}, {transform_indices = @transform_3, window_bounds = array<i64: 8, 128>}, {transform_indices = @transform_4, window_bounds = array<i64: 1, 8, 128>}]} {
    %c0 = arith.constant 0 : index
    %c0_0 = arith.constant 0 : index
    %0 = vector.load %arg1[%c0, %c0_0] : memref<8x128xf32, #tpu.memory_space<vmem>>, vector<8x128xf32>
    %c0_1 = arith.constant 0 : index
    %c0_2 = arith.constant 0 : index
    %c0_3 = arith.constant 0 : index
    %1 = vector.load %arg2[%c0_1, %c0_2, %c0_3] : memref<3x128x128xf32, #tpu.memory_space<vmem>>, vector<1x128x128xf32>
    %2 = vector.shape_cast %1 : vector<1x128x128xf32> to vector<128x128xf32>
    %cst = arith.constant dense<0.000000e+00> : vector<8x128xf32>
    %3 = tpu.matmul %0, %2, %cst {dimension_numbers = #tpu.dot_dimension_numbers<[1], [0], [0], [1], [0, 0, 1, 1], [], []>} : vector<8x128xf32>, vector<128x128xf32>, vector<8x128xf32> -> vector<8x128xf32>
    %c0_4 = arith.constant 0 : index
    %c0_5 = arith.constant 0 : index
    %4 = vector.load %arg3[%c0_4, %c0_5] : memref<8x128xf32, #tpu.memory_space<vmem>>, vector<1x128xf32>
    %5 = vector.broadcast %4 : vector<1x128xf32> to vector<8x128xf32>
    %6 = arith.addf %3, %5 : vector<8x128xf32>
    %cst_6 = arith.constant 0.000000e+00 : f32
    %7 = vector.broadcast %cst_6 : f32 to vector<8x128xf32>
    %8 = arith.maximumf %6, %7 : vector<8x128xf32>
    %c1 = arith.constant 1 : index
    %c0_7 = arith.constant 0 : index
    %c0_8 = arith.constant 0 : index
    %9 = vector.load %arg2[%c1, %c0_7, %c0_8] : memref<3x128x128xf32, #tpu.memory_space<vmem>>, vector<1x128x128xf32>
    %10 = vector.shape_cast %9 : vector<1x128x128xf32> to vector<128x128xf32>
    %cst_9 = arith.constant dense<0.000000e+00> : vector<8x128xf32>
    %11 = tpu.matmul %8, %10, %cst_9 {dimension_numbers = #tpu.dot_dimension_numbers<[1], [0], [0], [1], [0, 0, 1, 1], [], []>} : vector<8x128xf32>, vector<128x128xf32>, vector<8x128xf32> -> vector<8x128xf32>
    %c1_10 = arith.constant 1 : index
    %c0_11 = arith.constant 0 : index
    %12 = vector.load %arg3[%c1_10, %c0_11] : memref<8x128xf32, #tpu.memory_space<vmem>>, vector<1x128xf32>
    %13 = vector.broadcast %12 : vector<1x128xf32> to vector<8x128xf32>
    %14 = arith.addf %11, %13 : vector<8x128xf32>
    %cst_12 = arith.constant 0.000000e+00 : f32
    %15 = vector.broadcast %cst_12 : f32 to vector<8x128xf32>
    %16 = arith.maximumf %14, %15 : vector<8x128xf32>
    %c2 = arith.constant 2 : index
    %c0_13 = arith.constant 0 : index
    %c0_14 = arith.constant 0 : index
    %17 = vector.load %arg2[%c2, %c0_13, %c0_14] : memref<3x128x128xf32, #tpu.memory_space<vmem>>, vector<1x128x128xf32>
    %18 = vector.shape_cast %17 : vector<1x128x128xf32> to vector<128x128xf32>
    %cst_15 = arith.constant dense<0.000000e+00> : vector<8x128xf32>
    %19 = tpu.matmul %16, %18, %cst_15 {dimension_numbers = #tpu.dot_dimension_numbers<[1], [0], [0], [1], [0, 0, 1, 1], [], []>} : vector<8x128xf32>, vector<128x128xf32>, vector<8x128xf32> -> vector<8x128xf32>
    %c2_16 = arith.constant 2 : index
    %c0_17 = arith.constant 0 : index
    %20 = vector.load %arg3[%c2_16, %c0_17] : memref<8x128xf32, #tpu.memory_space<vmem>>, vector<1x128xf32>
    %21 = vector.broadcast %20 : vector<1x128xf32> to vector<8x128xf32>
    %22 = arith.addf %19, %21 : vector<8x128xf32>
    %23 = vector.extract_strided_slice %22 {offsets = [0, 9], sizes = [8, 1], strides = [1, 1]} : vector<8x128xf32> to vector<8x1xf32>
    %24 = vector.shape_cast %23 : vector<8x1xf32> to vector<1x8x1xf32>
    %cst_18 = arith.constant dense<0.000000e+00> : vector<1xf32>
    %25 = vector.multi_reduction <add>, %24, %cst_18 [1, 2] : vector<1x8x1xf32> to vector<1xf32>
    %26 = vector.shape_cast %25 : vector<1xf32> to vector<1x1x1xf32>
    %27 = vector.extract %26[0, 0, 0] : f32 from vector<1x1x1xf32>
    %28 = vector.broadcast %27 : f32 to vector<1x8x128xf32>
    %c0_19 = arith.constant 0 : index
    %c0_20 = arith.constant 0 : index
    %c0_21 = arith.constant 0 : index
    %29 = vector.load %arg5[%c0_19, %c0_20, %c0_21] : memref<1x8x128xf32, #tpu.memory_space<vmem>>, vector<1x8x128xf32>
    tpu.vector_store %arg5[%c0_19, %c0_20, %c0_21], %28 {strides = array<i32>} : memref<1x8x128xf32, #tpu.memory_space<vmem>>, vector<1x8x128xf32>,
    %30 = vector.extract_strided_slice %22 {offsets = [0, 8], sizes = [8, 1], strides = [1, 1]} : vector<8x128xf32> to vector<8x1xf32>
    %31 = vector.broadcast %30 : vector<8x1xf32> to vector<8x128xf32>
    %32 = arith.addf %22, %31 : vector<8x128xf32>
    %c0_22 = arith.constant 0 : index
    %c0_23 = arith.constant 0 : index
    %33 = vector.load %arg4[%c0_22, %c0_23] : memref<8x128xf32, #tpu.memory_space<vmem>>, vector<8x128xf32>
    tpu.vector_store %arg4[%c0_22, %c0_23], %32 {strides = array<i32>} : memref<8x128xf32, #tpu.memory_space<vmem>>, vector<8x128xf32>,
    return
  }
  func.func @transform_0(%arg0: i32) -> (i32, i32) {
    %c0_i32 = arith.constant 0 : i32
    %c0_i32_0 = arith.constant 0 : i32
    return %arg0, %c0_i32 : i32, i32
  }
  func.func @transform_1(%arg0: i32) -> (i32, i32, i32) {
    %c0_i32 = arith.constant 0 : i32
    %c0_i32_0 = arith.constant 0 : i32
    %c0_i32_1 = arith.constant 0 : i32
    %c0_i32_2 = arith.constant 0 : i32
    return %c0_i32, %c0_i32_0, %c0_i32_1 : i32, i32, i32
  }
  func.func @transform_2(%arg0: i32) -> (i32, i32) {
    %c0_i32 = arith.constant 0 : i32
    %c0_i32_0 = arith.constant 0 : i32
    %c0_i32_1 = arith.constant 0 : i32
    return %c0_i32, %c0_i32_0 : i32, i32
  }
  func.func @transform_3(%arg0: i32) -> (i32, i32) {
    %c0_i32 = arith.constant 0 : i32
    %c0_i32_0 = arith.constant 0 : i32
    return %arg0, %c0_i32 : i32, i32
  }
  func.func @transform_4(%arg0: i32) -> (i32, i32, i32) {
    %c0_i32 = arith.constant 0 : i32
    %c0_i32_0 = arith.constant 0 : i32
    %c0_i32_1 = arith.constant 0 : i32
    return %arg0, %c0_i32, %c0_i32_0 : i32, i32, i32
  }
}

</mosaic_0001>

<bundles_post_ra>
// kernel: duelling_dnn_forward.1
= control target key start
LH: loop header
LB: loop body
LE: loop exit
PB: predicated region body
PF: predicated region fallthrough
CT: control target
= control target key end

     0   :  { %10 = vsyncpa [#allocation3], 0  ;;  %s607_s15 = smov [#allocation2]   ;;  %s700_s0 = inlined_call_operand.vmem [shape: f32[8,128], index: 0, kind: input, shape index: {}]   ;;  %s701_s1 = inlined_call_operand.hbm [shape: f32[3,128,128], index: 1, kind: input, shape index: {}]   ;;  %s702_s2 = inlined_call_operand.vmem [shape: f32[8,128], index: 2, kind: input, shape index: {}]   ;;  %s703_s3 = inlined_call_operand.vmem [shape: f32[8,128], index: 3, kind: output, shape index: {0}]   ;;  %s704_s4 = inlined_call_operand.vmem [shape: f32[1,8,128], index: 4, kind: output, shape index: {1}]  }
   0x1   :  { %s18_s16 = sshll.u32 %s607_s15, 4  ;;  %s583_s19 = scalar_lea.hbm %s701_s1, 6144  ;;  %s19_s16 = int_to_ptr.vmem [resolvable:$true] %s18_s16 }
   0x2   :  { %p584_p0 = scmp.ne.s32.totalorder %s701_s1, %s583_s19  ;;  %p587_p1 = scmp.lt.u32.totalorder %s583_s19, %s701_s1 }
   0x4   :  { %p589_p2 = pnand %p587_p1, %p584_p0 }
   0x6   :  { %592 = shalt.err (!%p589_p2)
}
   0x7   :  { %s593_s24 = scalar_lea.vmem %s19_s16, 6144  ;;  %p598_p4 = scmp.lt.s32.totalorder %s19_s16, %s19_s16 }
   0x8   :  { %p594_p3 = scmp.ne.s32.totalorder %s19_s16, %s593_s24  ;;  %p599_p5 = scmp.lt.s32.totalorder %s593_s24, %s593_s24 }
   0xa   :  { %p600_p6 = por %p599_p5, %p598_p4 }
   0xc   :  { %p601_p7 = pnand %p600_p6, %p594_p3 }
   0xe   :  { %604 = shalt.err (!%p601_p7)
}
   0xf   :  { %s608_s25 = smov 128   ;;  %s609_s26 = smov 8  }
  0x10   :  { %24 = dma.hbm_to_vmem [thread:$0]  %s701_s1, 6144, %s19_s16, [#allocation3], %s608_s25, %s608_s25, %s609_s26  }
  0x11   :  { %605 = dma.done.wait [#allocation3], 6144  }
  0x12   :  { %606 = vsyncadd [#allocation3], 4294961152  ;;  %v610_v0 = vmov 0.0|0.0   ;;  %vm611_vm0 = vmmov 0   ;;  %v612_v1 = vmov 0.0   ;;  %v31_v2 = vld [vmem:[#allocation2] sm:$0xff] }
  0x13   :  { %499 = vmatprep.subr.bf16.mxu0 %v610_v0  ;;  %426 = vmatprep.mubr.msk.f32.mxu0 %vm611_vm0, %v612_v1  ;;  %v32_v3 = vld [vmem:[#allocation2 + $0x8] sm:$0xff]  ;;  %v33_v4 = vld [vmem:[#allocation2 + $0x10] sm:$0xff]  ;;  %v34_v6 = vld [vmem:[#allocation2 + $0x18] sm:$0xff]  ;;  %s614_s9 = smov 119   ;;  %vm312_vm1 = vcmask 7168  }
  0x14   :  { %523 = vmatprep.subr.bf16.mxu1 %v610_v0  ;;  %461 = vmatprep.mubr.msk.f32.mxu1 %vm611_vm0, %v612_v1  ;;  %v500_v5 = vpack.c.bf16 %v32_v3, %v31_v2  ;;  %v503_v7 = vpack.c.bf16 %v34_v6, %v33_v4  ;;  %v35_v8 = vld [vmem:[#allocation2 + $0x20] sm:$0xff]  ;;  %v36_v9 = vld [vmem:[#allocation2 + $0x28] sm:$0xff]  ;;  %v126_v12 = vld [vmem:[#allocation2 + $0x90] sm:$0xff] }
  0x15   :  { %v124_v10 = vld [vmem:[#allocation2 + $0x80] sm:$0xff]  ;;  %v125_v11 = vld [vmem:[#allocation2 + $0x88] sm:$0xff]  ;;  %v127_v13 = vld [vmem:[#allocation2 + $0x98] sm:$0xff]  ;;  %v506_v14 = vpack.c.bf16 %v36_v9, %v35_v8 }
  0x16   :  { %501 = vmatpush3.bf16.msra.mxu0 %v500_v5  ;;  %v524_v15 = vpack.c.bf16 %v125_v11, %v124_v10  ;;  %v37_v16 = vld [vmem:[#allocation2 + $0x30] sm:$0xff]  ;;  %v38_v17 = vld [vmem:[#allocation2 + $0x38] sm:$0xff]  ;;  %v527_v18 = vpack.c.bf16 %v127_v13, %v126_v12  ;;  %v128_v19 = vld [vmem:[#allocation2 + $0xa0] sm:$0xff] }
  0x17   :  { %502 = vmatprep.subr.bf16.mxu0 %v610_v0  ;;  %v129_v20 = vld [vmem:[#allocation2 + $0xa8] sm:$0xff]  ;;  %v509_v21 = vpack.c.bf16 %v38_v17, %v37_v16  ;;  %v39_v22 = vld [vmem:[#allocation2 + $0x40] sm:$0xff]  ;;  %v130_v25 = vld [vmem:[#allocation2 + $0xb0] sm:$0xff] }
  0x18   :  { %525 = vmatpush3.bf16.msra.mxu1 %v524_v15  ;;  %v40_v23 = vld [vmem:[#allocation2 + $0x48] sm:$0xff]  ;;  %v530_v24 = vpack.c.bf16 %v129_v20, %v128_v19  ;;  %v131_v26 = vld [vmem:[#allocation2 + $0xb8] sm:$0xff]  ;;  %v41_v28 = vld [vmem:[#allocation2 + $0x50] sm:$0xff] }
  0x19   :  { %526 = vmatprep.subr.bf16.mxu1 %v610_v0  ;;  %v512_v27 = vpack.c.bf16 %v40_v23, %v39_v22  ;;  %v42_v29 = vld [vmem:[#allocation2 + $0x58] sm:$0xff]  ;;  %v533_v30 = vpack.c.bf16 %v131_v26, %v130_v25  ;;  %v132_v31 = vld [vmem:[#allocation2 + $0xc0] sm:$0xff]  ;;  %v133_v32 = vld [vmem:[#allocation2 + $0xc8] sm:$0xff] }
  0x1a   :  { %504 = vmatpush3.bf16.msra.mxu0 %v503_v7  ;;  %v515_v33 = vpack.c.bf16 %v42_v29, %v41_v28  ;;  %v43_v34 = vld [vmem:[#allocation2 + $0x60] sm:$0xff]  ;;  %v44_v35 = vld [vmem:[#allocation2 + $0x68] sm:$0xff]  ;;  %v536_v36 = vpack.c.bf16 %v133_v32, %v132_v31  ;;  %v134_v37 = vld [vmem:[#allocation2 + $0xd0] sm:$0xff] }
  0x1b   :  { %505 = vmatprep.subr.bf16.mxu0 %v610_v0  ;;  %v135_v38 = vld [vmem:[#allocation2 + $0xd8] sm:$0xff]  ;;  %v518_v39 = vpack.c.bf16 %v44_v35, %v43_v34  ;;  %v45_v40 = vld [vmem:[#allocation2 + $0x70] sm:$0xff]  ;;  %v136_v43 = vld [vmem:[#allocation2 + $0xe0] sm:$0xff] }
  0x1c   :  { %528 = vmatpush3.bf16.msra.mxu1 %v527_v18  ;;  %v46_v41 = vld [vmem:[#allocation2 + $0x78] sm:$0xff]  ;;  %v539_v42 = vpack.c.bf16 %v135_v38, %v134_v37  ;;  %v137_v44 = vld [vmem:[#allocation2 + $0xe8] sm:$0xff]  ;;  %v30_v47 = vld [vmem:[%s700_s0] sm:$0xff] }
  0x1d   :  { %529 = vmatprep.subr.bf16.mxu1 %v610_v0  ;;  %v521_v45 = vpack.c.bf16 %v46_v41, %v45_v40  ;;  %v542_v46 = vpack.c.bf16 %v137_v44, %v136_v43  ;;  %v138_v48 = vld [vmem:[#allocation2 + $0xf0] sm:$0xff]  ;;  %v139_v49 = vld [vmem:[#allocation2 + $0xf8] sm:$0xff]  ;;  %v217_v51 = vld [vmem:[#allocation2 + $0x100] sm:$0xff] }
  0x1e   :  { %507 = vmatpush3.bf16.msra.mxu0 %v506_v14  ;;  %v545_v50 = vpack.c.bf16 %v139_v49, %v138_v48  ;;  %v218_v52 = vld [vmem:[#allocation2 + $0x108] sm:$0xff]  ;;  %v219_v53 = vld [vmem:[#allocation2 + $0x110] sm:$0xff]  ;;  %v220_v55 = vld [vmem:[#allocation2 + $0x118] sm:$0xff] }
  0x1f   :  { %508 = vmatprep.subr.bf16.mxu0 %v610_v0  ;;  %v548_v54 = vpack.c.bf16 %v218_v52, %v217_v51  ;;  %v551_v56 = vpack.c.bf16 %v220_v55, %v219_v53  ;;  %v221_v57 = vld [vmem:[#allocation2 + $0x120] sm:$0xff]  ;;  %v222_v58 = vld [vmem:[#allocation2 + $0x128] sm:$0xff]  ;;  %v223_v60 = vld [vmem:[#allocation2 + $0x130] sm:$0xff] }
  0x20   :  { %531 = vmatpush3.bf16.msra.mxu1 %v530_v24  ;;  %v554_v59 = vpack.c.bf16 %v222_v58, %v221_v57  ;;  %v224_v61 = vld [vmem:[#allocation2 + $0x138] sm:$0xff]  ;;  %v225_v63 = vld [vmem:[#allocation2 + $0x140] sm:$0xff]  ;;  %v227_v3 = vld [vmem:[#allocation2 + $0x150] sm:$0xff] }
  0x21   :  { %532 = vmatprep.subr.bf16.mxu1 %v610_v0  ;;  %v557_v62 = vpack.c.bf16 %v224_v61, %v223_v60  ;;  %v228_v4 = vld [vmem:[#allocation2 + $0x158] sm:$0xff]  ;;  %v229_v6 = vld [vmem:[#allocation2 + $0x160] sm:$0xff]  ;;  %v230_v7 = vld [vmem:[#allocation2 + $0x168] sm:$0xff] }
  0x22   :  { %510 = vmatpush3.bf16.msra.mxu0 %v509_v21  ;;  %v563_v5 = vpack.c.bf16 %v228_v4, %v227_v3  ;;  %v566_v8 = vpack.c.bf16 %v230_v7, %v229_v6  ;;  %v340_v9 = vld [vmem:[%s702_s2] ss:$0 sm:$0xff]  ;;  %v231_v14 = vld [vmem:[#allocation2 + $0x170] sm:$0xff]  ;;  %v232_v15 = vld [vmem:[#allocation2 + $0x178] sm:$0xff]  ;;  %v613_v21 = vmov 8  }
  0x23   :  { %511 = vmatprep.subr.bf16.mxu0 %v610_v0  ;;  %v569_v16 = vpack.c.bf16 %v232_v15, %v231_v14  ;;  %v341_v17 = vld [vmem:[%s702_s2 + $0x1] ss:$0 sm:$0xff]  ;;  %581 = vset.pattern.permute.xlu1 %v613_v21  ;;  %v342_v22 = vld [vmem:[%s702_s2 + $0x2] ss:$0 sm:$0xff] }
  0x24   :  { %534 = vmatpush3.bf16.msra.mxu1 %v533_v30  ;;  %582 = vset.pattern.permute.xlu0 %v613_v21 }
  0x25   :  { %535 = vmatprep.subr.bf16.mxu1 %v610_v0 }
  0x26   :  { %513 = vmatpush3.bf16.msra.mxu0 %v512_v27 }
  0x27   :  { %514 = vmatprep.subr.bf16.mxu0 %v610_v0 }
  0x28   :  { %537 = vmatpush3.bf16.msra.mxu1 %v536_v36 }
  0x29   :  { %538 = vmatprep.subr.bf16.mxu1 %v610_v0 }
  0x2a   :  { %516 = vmatpush3.bf16.msra.mxu0 %v515_v33 }
  0x2b   :  { %517 = vmatprep.subr.bf16.mxu0 %v610_v0 }
  0x2c   :  { %540 = vmatpush3.bf16.msra.mxu1 %v539_v42 }
  0x2d   :  { %541 = vmatprep.subr.bf16.mxu1 %v610_v0 }
  0x2e   :  { %519 = vmatpush3.bf16.msra.mxu0 %v518_v39 }
  0x2f   :  { %520 = vmatprep.subr.bf16.mxu0 %v610_v0 }
  0x30   :  { %543 = vmatpush3.bf16.msra.mxu1 %v542_v46 }
  0x31   :  { %544 = vmatprep.subr.bf16.mxu1 %v610_v0 }
  0x32   :  { %522 = vmatpush3.bf16.msra.mxu0 %v521_v45 }
  0x33   :  { %547 = vmatprep.subr.bf16.mxu0 %v610_v0 }
  0x34   :  { %546 = vmatpush3.bf16.msra.mxu1 %v545_v50 }
  0x35   :  { %427 = vmatmul.mubr.f32.vlgmr.msra.gmra.mrb[0].mxu0 %v30_v47 }
  0x36   :  { %496 = vmatprep.mubr.msk.f32.mxu0 %vm611_vm0, %v612_v1  ;;  %549 = vmatpush3.bf16.msra.mxu0 %v548_v54  ;;  %v226_v1 = vld [vmem:[#allocation2 + $0x148] sm:$0xff] }
  0x37   :  { %550 = vmatprep.subr.bf16.mxu0 %v610_v0  ;;  %v560_v2 = vpack.c.bf16 %v226_v1, %v225_v63 }
  0x3a   :  { %552 = vmatpush3.bf16.msra.mxu0 %v551_v56 }
  0x3b   :  { %553 = vmatprep.subr.bf16.mxu0 %v610_v0 }
  0x3e   :  { %555 = vmatpush3.bf16.msra.mxu0 %v554_v59 }
  0x3f   :  { %556 = vmatprep.subr.bf16.mxu0 %v610_v0 }
  0x42   :  { %558 = vmatpush3.bf16.msra.mxu0 %v557_v62 }
  0x43   :  { %559 = vmatprep.subr.bf16.mxu0 %v610_v0 }
  0x46   :  { %561 = vmatpush3.bf16.msra.mxu0 %v560_v2 }
  0x47   :  { %562 = vmatprep.subr.bf16.mxu0 %v610_v0 }
  0x4a   :  { %564 = vmatpush3.bf16.msra.mxu0 %v563_v5 }
  0x4b   :  { %565 = vmatprep.subr.bf16.mxu0 %v610_v0 }
  0x4e   :  { %567 = vmatpush3.bf16.msra.mxu0 %v566_v8 }
  0x4f   :  { %568 = vmatprep.subr.bf16.mxu0 %v610_v0 }
  0x52   :  { %570 = vmatpush3.bf16.msra.mxu0 %v569_v16 }
 0x108   :  { %v118_v10 = vpop.f32.mrb[0].mxu0 }
 0x109   :  { %v119_v11 = vadd.f32 %v340_v9, %v118_v10  ;;  %v428_v12 = vpop.f32.mrb[1].mxu0 }
 0x10b   :  { %v122_v13 = vmax.f32 %v119_v11, 0.0 }
 0x10d   :  { %462 = vmatmul.mubr.f32.vlgmr.msra.gmra.mrb[0].mxu1 %v122_v13 }
 0x1e0   :  { %v211_v18 = vpop.f32.mrb[0].mxu1 }
 0x1e1   :  { %v212_v19 = vadd.f32 %v341_v17, %v211_v18  ;;  %v463_v0 = vpop.f32.mrb[1].mxu1 }
 0x1e3   :  { %v215_v20 = vmax.f32 %v212_v19, 0.0 }
 0x1e5   :  { %497 = vmatmul.mubr.f32.vlgmr.msra.gmra.mrb[2].mxu0 %v215_v20 }
 0x2b8   :  { %v304_v23 = vpop.f32.mrb[2].mxu0 }
 0x2b9   :  { %v305_v24 = vadd.f32 %v342_v22, %v304_v23  ;;  %v498_v25 = vpop.f32.mrb[3].mxu0 }
 0x2bb   :  { %326 = vperm.xlu1 %581, %v305_v24   ;;  %309 = vrot.lane.b32.xlu0 %v305_v24, %s614_s9 }
 0x32d   :  { %v310_v26 = vpop.permute.xlu0 %309 }
 0x32e   :  { %v313_v27 = vsel %vm312_vm1, %v310_v26, 0.0 }
 0x32f   :  { %314 = vadd.xlane.f32.xlu0 %v313_v27 }
 0x33a   :  { %v327_v28 = vpop.permute.xlu1 %326 }
 0x33b   :  { %v329_v29 = vadd.f32 %v327_v28, %v305_v24 }
 0x33d   :  { %330 = vst [vmem:[%s703_s3] sm:$0xff] %v329_v29 }
 0x3bc   :  { %v315_v30 = vpop.xlane.xlu0 %314 }
 0x3bd   :  { %v316_v31 = vrot.slane %v315_v30, 4 }
 0x3bf   :  { %v317_v32 = vadd.f32 %v316_v31, %v315_v30 }
 0x3c1   :  { %v318_v33 = vrot.slane %v317_v32, 2 }
 0x3c3   :  { %v319_v34 = vadd.f32 %v318_v33, %v317_v32 }
 0x3c5   :  { %v320_v35 = vrot.slane %v319_v34, 1 }
 0x3c7   :  { %v321_v36 = vadd.f32 %v320_v35, %v319_v34 }
 0x3c9   :  { %571 = vpush %v321_v36 }
 0x3fa   :  { %s572_s2 = spop %571 }
 0x3fb   :  { %v323_v37 = vstv %s572_s2 }
 0x3fc   :  { %324 = vst [vmem:[%s704_s4] sm:$0xff] %v323_v37 }
 0x3fd   :  { %339 = vsyncpa [#allocation3], 1 }

</bundles_post_ra>
